<compile_context>
chip_gen: v7x
topology: tpu7x:2x2x1
jax: 0.10.0
libtpu: 0.0.40
codegen_flags: <defaults>
</compile_context>

<pallas_src>
import jax
import jax.numpy as jnp
from jax.experimental import pallas as pl
from jax.experimental.pallas import tpu as pltpu

MAX_LANE_WIDTH = 2048            # lane-dense last dim cap (multiple of 128)
MAX_BLOCK_BYTES = 4 << 20        # ~4 MiB f32 blocks (v6e/v7x DMA sweet spot)
VMEM_LIMIT_BYTES = 48 << 20      # 2x in + 2x out double-buffered 4 MiB blocks + headroom,
                                 # below v7x's 64 MiB physical per-TC VMEM
SMALL_FALLBACK_ELEMS = 64 * 1024 # < 256 KiB f32 -> fused XLA beats kernel launch overhead
PAD_LANE_WIDTH = 512             # only used when no copy-free factorization exists


def conv1x1_kernel(w_ref, b_ref, x_ref, o_ref):
    # w_ref / b_ref are (1, 1) SMEM scalars; x_ref / o_ref are VMEM tiles.
    o_ref[...] = x_ref[...] * w_ref[0, 0] + b_ref[0, 0]


def _largest_lane_divisor(total):
    """Largest multiple-of-128 divisor of `total` that is <= MAX_LANE_WIDTH."""
    for lw in range(MAX_LANE_WIDTH, 127, -128):
        if total % lw == 0:
            return lw
    return None


def _row_block(rows, lane_width):
    """Row-block size: ~MAX_BLOCK_BYTES per block, at least 2 blocks when possible."""
    max_rows = max(8, MAX_BLOCK_BYTES // (lane_width * 4))
    if rows <= 16:
        return rows                       # tiny slab: single full-array block
    half = (pl.cdiv(rows, 2) + 7) // 8 * 8  # split into >= 2 blocks, rows multiple of 8
    return min(max_rows, half, rows)


def conv1x1_forward(x, weight, bias, *, donate_input=False):
    """x: (N, 1, H, W) float32; weight: (1, 1, 1, 1); bias: (1,)."""
    N, C, H, W = x.shape
    assert C == 1, "BackboneModel1.conv1 expects a single input channel"

    w = weight.reshape(()).astype(jnp.float32)
    b = bias.reshape(()).astype(jnp.float32)
    total = N * C * H * W

    # --- small-input fast path: fused VPU expression, no custom-call overhead ---
    if total < SMALL_FALLBACK_ELEMS:
        return (x.astype(jnp.float32) * w + b).astype(jnp.float32)

    flat = x.reshape(-1).astype(jnp.float32)

    # --- copy-free lane-dense factorization (no pad, no slice) ---
    lane = _largest_lane_divisor(total)
    if lane is not None:
        rows = total // lane
        pad = 0
        x2d = flat.reshape(rows, lane)
    else:
        # TODO(synk): reached only when `total` has no multiple-of-128 divisor;
        # the pad + trailing slice each cost one extra HBM pass.
        lane = PAD_LANE_WIDTH
        rows = pl.cdiv(total, lane)
        pad = rows * lane - total
        x2d = jnp.pad(flat, (0, pad)).reshape(rows, lane)

    tm = _row_block(rows, lane)
    grid = (pl.cdiv(rows, tm),)

    w2d = w.reshape(1, 1)
    b2d = b.reshape(1, 1)

    out2d = pl.pallas_call(
        conv1x1_kernel,
        out_shape=jax.ShapeDtypeStruct((rows, lane), jnp.float32),
        grid=grid,
        in_specs=[
            pl.BlockSpec(memory_space=pltpu.MemorySpace.SMEM),   # weight scalar
            pl.BlockSpec(memory_space=pltpu.MemorySpace.SMEM),   # bias scalar
            pl.BlockSpec((tm, lane), lambda i: (i, 0)),          # input tile
        ],
        out_specs=pl.BlockSpec((tm, lane), lambda i: (i, 0)),
        compiler_params=pltpu.CompilerParams(
            # parallel -> sharded across both TensorCores on v7x; no-op on v5e/v6e
            dimension_semantics=("parallel",),
            vmem_limit_bytes=VMEM_LIMIT_BYTES,
        ),
        cost_estimate=pl.CostEstimate(
            flops=2 * rows * lane,
            transcendentals=0,
            bytes_accessed=2 * rows * lane * 4,   # actual (padded) read + write traffic
        ),
        # Opt-in aliasing: halves HBM footprint when the caller no longer needs x.
        input_output_aliases=({2: 0} if donate_input else {}),
    )(w2d, b2d, x2d)

    out = out2d.reshape(-1)
    if pad:
        out = out[:total]
    return out.reshape(N, C, H, W)


if __name__ == "__main__":
    key = jax.random.PRNGKey(0)
    k_x1, k_x2, k_w, k_b = jax.random.split(key, 4)

    # Conv2d(1, 1, 1, 1) parameters; PyTorch default init with fan_in = 1 -> U(-1, 1).
    weight = jax.random.uniform(k_w, (1, 1, 1, 1), minval=-1.0, maxval=1.0,
                                dtype=jnp.float32)
    bias = jax.random.uniform(k_b, (1,), minval=-1.0, maxval=1.0,
                              dtype=jnp.float32)

    # 1) Tiny input (2x1x16x16 = 2 KiB): exercises the fused-XLA fast path.
    x_small = jax.random.normal(k_x1, (2, 1, 16, 16), dtype=jnp.float32)
    out_small = jax.block_until_ready(conv1x1_forward(x_small, weight, bias))
    ref_small = x_small * weight.reshape(()) + bias.reshape(())
    assert out_small.shape == x_small.shape
    assert jnp.allclose(out_small, ref_small, atol=1e-6), "fast path mismatch"

    # 2) Larger input (2x1x256x256 = 512 KiB): exercises the Pallas kernel path
    #    (copy-free reshape to (64, 2048), tm=32 -> grid=(2,), double-buffered DMA).
    x_big = jax.random.normal(k_x2, (2, 1, 256, 256), dtype=jnp.float32)
    out_big = jax.block_until_ready(conv1x1_forward(x_big, weight, bias))
    ref_big = x_big * weight.reshape(()) + bias.reshape(())
    assert out_big.shape == x_big.shape
    assert jnp.allclose(out_big, ref_big, atol=1e-6), "pallas path mismatch"

    print("KERNEL_OK")
</pallas_src>

<mosaic_0001>
module attributes {stable_mosaic.version = 11 : i64} {
  func.func @conv1x1_kernel(%arg0: i32, %arg1: memref<1x1xf32, #tpu.memory_space<smem>>, %arg2: memref<1x1xf32, #tpu.memory_space<smem>>, %arg3: memref<32x2048xf32, #tpu.memory_space<vmem>>, %arg4: memref<32x2048xf32, #tpu.memory_space<vmem>>) attributes {dimension_semantics = [#tpu.dimension_semantics<parallel>], iteration_bounds = array<i64: 2>, scalar_prefetch = 0 : i64, scratch_operands = 0 : i64, tpu.core_type = #tpu.core_type<tc>, window_params = [{transform_indices = @transform_0, window_bounds = array<i64: 1, 1>}, {transform_indices = @transform_1, window_bounds = array<i64: 1, 1>}, {transform_indices = @transform_2, window_bounds = array<i64: 32, 2048>}, {transform_indices = @transform_3, window_bounds = array<i64: 32, 2048>}]} {
    %c0 = arith.constant 0 : index
    %c0_0 = arith.constant 0 : index
    %0 = vector.load %arg3[%c0, %c0_0] : memref<32x2048xf32, #tpu.memory_space<vmem>>, vector<32x2048xf32>
    %c0_1 = arith.constant 0 : index
    %c0_2 = arith.constant 0 : index
    %1 = memref.load %arg1[%c0_1, %c0_2] : memref<1x1xf32, #tpu.memory_space<smem>>
    %2 = vector.broadcast %1 : f32 to vector<32x2048xf32>
    %3 = arith.mulf %0, %2 : vector<32x2048xf32>
    %c0_3 = arith.constant 0 : index
    %c0_4 = arith.constant 0 : index
    %4 = memref.load %arg2[%c0_3, %c0_4] : memref<1x1xf32, #tpu.memory_space<smem>>
    %5 = vector.broadcast %4 : f32 to vector<32x2048xf32>
    %6 = arith.addf %3, %5 : vector<32x2048xf32>
    %c0_5 = arith.constant 0 : index
    %c0_6 = arith.constant 0 : index
    %7 = vector.load %arg4[%c0_5, %c0_6] : memref<32x2048xf32, #tpu.memory_space<vmem>>, vector<32x2048xf32>
    tpu.vector_store %arg4[%c0_5, %c0_6], %6 {strides = array<i32>} : memref<32x2048xf32, #tpu.memory_space<vmem>>, vector<32x2048xf32>,
    return
  }
  func.func @transform_0(%arg0: i32) -> (i32, i32) {
    %c0_i32 = arith.constant 0 : i32
    %c0_i32_0 = arith.constant 0 : i32
    %c0_i32_1 = arith.constant 0 : i32
    return %c0_i32, %c0_i32_0 : i32, i32
  }
  func.func @transform_1(%arg0: i32) -> (i32, i32) {
    %c0_i32 = arith.constant 0 : i32
    %c0_i32_0 = arith.constant 0 : i32
    %c0_i32_1 = arith.constant 0 : i32
    return %c0_i32, %c0_i32_0 : i32, i32
  }
  func.func @transform_2(%arg0: i32) -> (i32, i32) {
    %c0_i32 = arith.constant 0 : i32
    %c0_i32_0 = arith.constant 0 : i32
    return %arg0, %c0_i32 : i32, i32
  }
  func.func @transform_3(%arg0: i32) -> (i32, i32) {
    %c0_i32 = arith.constant 0 : i32
    %c0_i32_0 = arith.constant 0 : i32
    return %arg0, %c0_i32 : i32, i32
  }
}

</mosaic_0001>

<bundles_post_ra>
// kernel: tpu_custom_call.1
= control target key start
LH: loop header
LB: loop body
LE: loop exit
PB: predicated region body
PF: predicated region fallthrough
CT: control target
= control target key end

     0   :  { %s1173_s0 = inlined_call_operand.<no memory space> [shape: f32[1,1], index: 0, kind: input, shape index: {}]   ;;  %s1174_s1 = inlined_call_operand.<no memory space> [shape: f32[1,1], index: 1, kind: input, shape index: {}]   ;;  %s1175_s2 = inlined_call_operand.hbm [shape: f32[64,2048], index: 2, kind: input, shape index: {}]   ;;  %s1176_s3 = inlined_call_operand.hbm [shape: f32[64,2048], index: 3, kind: output, shape index: {}]  }
   0x1   :  { %8 = sst [smem:[#allocation2]] %s1173_s0 }
   0x2   :  { %9 = sst [smem:[#allocation3]] %s1174_s1 }
   0x3   :  { %10 = vsyncpa [#allocation5], 0 }
   0x4   :  { %12 = vsyncpa [#allocation5 + $0x1], 0 }
   0x5   :  { %13 = vsyncpa [#allocation6], 0 }
   0x6   :  { %15 = vsyncpa [#allocation6 + $0x1], 0  ;;  %s742_s16 = smov 0   ;;  %s744_s17 = smov 0  }
   0x7   :  { %s746_s18 = smov 0   ;;  %s748_s19 = smov 0  }
   0x8 LB: > { %s763_s0 = sadd.s32 4294967295, %s708_s19   ;;  %s542_s1 = sadd.s32 4294967294, %s708_s19   ;;  %s708_s19 = sphi %s748_s19, %s1189_s19   ;;  %s704_s18 = sphi %s746_s18, %s1188_s18   ;;  %s700_s17 = sphi %s744_s17, %s1187_s17   ;;  %s696_s16 = sphi %s742_s16, %s1186_s16  }
   0x9   : > { %s767_s20 = sadd.s32 1, %s708_s19   ;;  %s70_s21 = sadd.s32 1, %s704_s18 }
   0xa   : > { %s67_s22 = ssub.s32 %s708_s19, %s767_s20  ;;  %p77_p0 = scmp.ne.s32.totalorder %s704_s18, %s700_s17 }
   0xb   : > { %p68_p1 = scmp.eq.s32.totalorder %s67_s22, 0  ;;  %p78_p2 = scmp.eq.s32.totalorder %s708_s19, 0 }
   0xc   : > { %p83_p3 = scmp.ne.s32.totalorder %s700_s17, %s696_s16  ;;  %p84_p4 = scmp.eq.s32.totalorder %s763_s0, 0 }
   0xd   : > { %s779_s23 = scalar_select %p68_p1, %s704_s18, %s70_s21  }
   0xe   : > { %p781_p5 = por %p78_p2, %p77_p0  ;;  %p785_p6 = por %p84_p4, %p83_p3 }
   0xf   : > { %p107_p7 = scmp.eq.s32.totalorder %s763_s0, 1  ;;  %p113_p8 = scmp.eq.s32.totalorder %s542_s1, 1 }
  0x10   : > { %p574_p10 = scmp.lt.s32.totalorder %s708_s19, 2  ;;  %s139_s28 = sand.u32 1, %s704_s18  }
  0x11   : > { %p792_p11 = por %p107_p7, %p77_p0  ;;  %p796_p12 = por %p113_p8, %p83_p3 }
  0x12   : > { %s559_s29 = sshll.u32 %s708_s19, 13  ;;  %s545_s30 = sshll.u32 %s139_s28, 9 }
  0x13   : > { %s1180_s26 = scalar_select %p792_p11, 1, 0 }
  0x14   : > { %s1181_s27 = scalar_select %p796_p12, 1, 0 }
  0x15   : > { %s805_s6 = scalar_lea.hbm %s1175_s2, %s559_s29  ;;  %s143_s7 = scalar_lea.vmem [#allocation4], %s545_s30 }
  0x16   : > { %s151_s8 = sshll.u32 %s143_s7, 4  ;;  %p809_p13 = pnand %p574_p10, %p781_p5  ;;  %s813_s8 = int_to_ptr.vmem [resolvable:$true] %s151_s8 }
  0x17   : > { %s815_s10 = scalar_lea.sflag [#allocation5], %s139_s28  ;;  %s612_s11 = scalar_lea.hbm %s805_s6, 8192 }
  0x18   : > { %p613_p0 = scmp.ne.s32.totalorder %s805_s6, %s612_s11  ;;  %p614_p1 = pneg %p809_p13 }
  0x19   : > { %s617_s14 = scalar_lea.hbm %s1175_s2, 16384  ;;  %p618_p4 = scmp.lt.u32.totalorder %s805_s6, %s1175_s2 }
  0x1a   : > { %p615_p2 = pnand %p614_p1, %p613_p0  ;;  %p619_p5 = scmp.lt.u32.totalorder %s617_s14, %s612_s11 }
  0x1b   : > { %p621_p8 = scmp.lt.u32.totalorder %s612_s11, %s805_s6 }
  0x1c   : > { %p616_p3 = pneg %p615_p2  ;;  %p620_p7 = por %p619_p5, %p618_p4 }
  0x1e   : > { %p622_p10 = por %p621_p8, %p620_p7 }
  0x20   : > { %p623_p9 = pnand %p622_p10, %p616_p3 }
  0x22   : > { %626 = shalt.err (!%p623_p9)
}
  0x23   : > { %s627_s21 = scalar_lea.vmem %s813_s8, 8192  ;;  %s710_s22 = smov [#allocation4]  }
  0x24   : > { %p628_p0 = scmp.ne.s32.totalorder %s813_s8, %s627_s21  ;;  %s632_s24 = sshll.u32 %s710_s22, 4  ;;  %s633_s24 = int_to_ptr.vmem [resolvable:$false] %s632_s24 }
  0x25   : > { %s634_s28 = scalar_lea.vmem %s633_s24, 16384  ;;  %p635_p11 = scmp.lt.s32.totalorder %s813_s8, %s633_s24 }
  0x26   : > { %p630_p2 = pnand %p628_p0, %p614_p1  ;;  %p636_p4 = scmp.lt.s32.totalorder %s634_s28, %s627_s21 }
  0x28   : > { %p631_p12 = pneg %p630_p2  ;;  %p637_p5 = por %p636_p4, %p635_p11 }
  0x2a   : > { %p638_p7 = pnand %p637_p5, %p631_p12 }
  0x2c   : > { %641 = shalt.err (!%p638_p7)
}
  0x2d   : > { %s711_s29 = smov 2048   ;;  %s712_s30 = smov 128  }
  0x2e   : > { %569 = dma.hbm_to_vmem [thread:$0]  (!%p809_p13), %s805_s6, 8192, %s813_s8, %s815_s10, %s711_s29, %s711_s29, %s712_s30  }
  0x2f   : > { %p549_p9 = scmp.ge.s32.totalorder %s708_s19, 1  ;;  %p159_p1 = scmp.lt.s32.totalorder %s708_s19, 3 }
  0x31   : > { %p160_p3 = pnand %p549_p9, %p159_p1 }
  0x32   : > { %s846_s4 = sand.u32 (!%p160_p3), 1, %s700_s17  }
  0x33   : > { %163 = sbr.rel (%p160_p3) target bundleno = 122 (0x7a), region = 32  ;;  %s550_s5 = sshll.u32 (!%p160_p3), %s846_s4, 9 }
  0x34   : > { %s166_s7 = scalar_lea.sflag (!%p160_p3), [#allocation5], %s846_s4  ;;  %s852_s11 = scalar_lea.vmem (!%p160_p3), [#allocation4], %s550_s5 }
  0x3a   : > { %687 = dma.done.wait (%p785_p6), %s166_s7, 8192  }
  0x3b   : > { %689 = vsyncadd (%p785_p6), %s166_s7, 4294959104  ;;  %s258_s6 = sld [smem:[#allocation2]]  ;;  %v194_v0 = vld [vmem:[%s852_s11] sm:$0xff]  ;;  %v195_v3 = vld [vmem:[%s852_s11 + $0x8] sm:$0xff]  ;;  %s891_s25 = scalar_lea.vmem [#allocation7], %s550_s5 }
  0x3c   : > { %s324_s8 = sld [smem:[#allocation3]]  ;;  %v196_v6 = vld [vmem:[%s852_s11 + $0x10] sm:$0xff]  ;;  %v197_v7 = vld [vmem:[%s852_s11 + $0x18] sm:$0xff]  ;;  %v198_v8 = vld [vmem:[%s852_s11 + $0x20] sm:$0xff]  ;;  %s561_s9 = sshll.u32 %s763_s0, 13 }
  0x3d   : > { %v199_v12 = vld [vmem:[%s852_s11 + $0x28] sm:$0xff]  ;;  %v200_v13 = vld [vmem:[%s852_s11 + $0x30] sm:$0xff]  ;;  %v201_v14 = vld [vmem:[%s852_s11 + $0x38] sm:$0xff]  ;;  %s469_s10 = sshll.u32 %s891_s25, 4  ;;  %s1120_s13 = scalar_lea.hbm %s1176_s3, %s561_s9  ;;  %s1122_s10 = int_to_ptr.vmem [resolvable:$true] %s469_s10 }
  0x3e   : > { %v202_v19 = vld [vmem:[%s852_s11 + $0x40] sm:$0xff]  ;;  %v203_v20 = vld [vmem:[%s852_s11 + $0x48] sm:$0xff]  ;;  %v204_v21 = vld [vmem:[%s852_s11 + $0x50] sm:$0xff]  ;;  %s455_s14 = scalar_lea.sflag [#allocation6], %s846_s4  ;;  %s642_s15 = scalar_lea.vmem %s1122_s10, 8192 }
  0x3f   : > { %v205_v26 = vld [vmem:[%s852_s11 + $0x58] sm:$0xff]  ;;  %v206_v27 = vld [vmem:[%s852_s11 + $0x60] sm:$0xff]  ;;  %v207_v28 = vld [vmem:[%s852_s11 + $0x68] sm:$0xff]  ;;  %p643_p6 = scmp.ne.s32.totalorder %s1122_s10, %s642_s15  ;;  %p1183_p11 = scmp.ne.s32.totalorder %s1180_s26, 0 }
  0x40   : > { %v208_v33 = vld [vmem:[%s852_s11 + $0x70] sm:$0xff]  ;;  %v209_v34 = vld [vmem:[%s852_s11 + $0x78] sm:$0xff]  ;;  %v210_v39 = vld [vmem:[%s852_s11 + $0x80] sm:$0xff]  ;;  %s713_s1 = smov [#allocation7]  }
  0x41   : > { %v859_v1 = vstv %s258_s6  ;;  %v211_v40 = vld [vmem:[%s852_s11 + $0x88] sm:$0xff]  ;;  %v212_v45 = vld [vmem:[%s852_s11 + $0x90] sm:$0xff]  ;;  %v213_v46 = vld [vmem:[%s852_s11 + $0x98] sm:$0xff]  ;;  %p644_p12 = pnand %p643_p6, %p1183_p11  ;;  %s646_s21 = sshll.u32 %s713_s1, 4  ;;  %s647_s21 = int_to_ptr.vmem [resolvable:$false] %s646_s21 }
  0x42   : > { %v861_v2 = vstv %s324_s8  ;;  %v260_v4 = vmul.f32 %v859_v1, %v194_v0  ;;  %v261_v5 = vmul.f32 %v859_v1, %v195_v3  ;;  %v262_v9 = vmul.f32 %v859_v1, %v196_v6  ;;  %v214_v47 = vld [vmem:[%s852_s11 + $0xa0] sm:$0xff]  ;;  %v215_v52 = vld [vmem:[%s852_s11 + $0xa8] sm:$0xff]  ;;  %v216_v53 = vld [vmem:[%s852_s11 + $0xb0] sm:$0xff]  ;;  %s648_s22 = scalar_lea.vmem %s647_s21, 16384  ;;  %p649_p8 = scmp.lt.s32.totalorder %s1122_s10, %s647_s21 }
  0x43   : > { %v263_v10 = vmul.f32 %v859_v1, %v197_v7  ;;  %v264_v11 = vmul.f32 %v859_v1, %v198_v8  ;;  %v265_v17 = vmul.f32 %v859_v1, %v199_v12  ;;  %v266_v18 = vmul.f32 %v859_v1, %v200_v13  ;;  %v217_v58 = vld [vmem:[%s852_s11 + $0xb8] sm:$0xff]  ;;  %v218_v63 = vld [vmem:[%s852_s11 + $0xc0] sm:$0xff]  ;;  %v219_v0 = vld [vmem:[%s852_s11 + $0xc8] sm:$0xff]  ;;  %p645_p13 = pneg %p644_p12  ;;  %p650_p10 = scmp.lt.s32.totalorder %s648_s22, %s642_s15 }
  0x44   : > { %v326_v15 = vadd.f32 %v861_v2, %v260_v4  ;;  %v327_v16 = vadd.f32 %v861_v2, %v261_v5  ;;  %v328_v22 = vadd.f32 %v861_v2, %v262_v9  ;;  %v267_v25 = vmul.f32 %v859_v1, %v201_v14  ;;  %v220_v7 = vld [vmem:[%s852_s11 + $0xd0] sm:$0xff]  ;;  %v221_v8 = vld [vmem:[%s852_s11 + $0xd8] sm:$0xff]  ;;  %v222_v9 = vld [vmem:[%s852_s11 + $0xe0] sm:$0xff] }
  0x45   : > { %v329_v23 = vadd.f32 %v861_v2, %v263_v10  ;;  %v330_v24 = vadd.f32 %v861_v2, %v264_v11  ;;  %v331_v29 = vadd.f32 %v861_v2, %v265_v17  ;;  %v332_v30 = vadd.f32 %v861_v2, %v266_v18  ;;  %v223_v14 = vld [vmem:[%s852_s11 + $0xe8] sm:$0xff]  ;;  %p651_p0 = por %p650_p10, %p649_p8 }
  0x46   : > { %390 = vst [vmem:[%s891_s25] sm:$0xff] %v326_v15  ;;  %391 = vst [vmem:[%s891_s25 + $0x8] sm:$0xff] %v327_v16  ;;  %v268_v31 = vmul.f32 %v859_v1, %v202_v19  ;;  %v269_v32 = vmul.f32 %v859_v1, %v203_v20  ;;  %v333_v35 = vadd.f32 %v861_v2, %v267_v25  ;;  %v224_v15 = vld [vmem:[%s852_s11 + $0xf0] sm:$0xff]  ;;  %v225_v20 = vld [vmem:[%s852_s11 + $0xf8] sm:$0xff] }
  0x47   : > { %392 = vst [vmem:[%s891_s25 + $0x10] sm:$0xff] %v328_v22  ;;  %393 = vst [vmem:[%s891_s25 + $0x18] sm:$0xff] %v329_v23  ;;  %v270_v36 = vmul.f32 %v859_v1, %v204_v21  ;;  %v271_v37 = vmul.f32 %v859_v1, %v205_v26  ;;  %v272_v38 = vmul.f32 %v859_v1, %v206_v27  ;;  %v226_v25 = vld [vmem:[%s852_s11 + $0x100] sm:$0xff]  ;;  %v227_v26 = vld [vmem:[%s852_s11 + $0x108] sm:$0xff]  ;;  %p652_p2 = pnand %p651_p0, %p645_p13 }
  0x48   : > { %394 = vst [vmem:[%s891_s25 + $0x20] sm:$0xff] %v330_v24  ;;  %395 = vst [vmem:[%s891_s25 + $0x28] sm:$0xff] %v331_v29  ;;  %v334_v41 = vadd.f32 %v861_v2, %v268_v31  ;;  %v335_v42 = vadd.f32 %v861_v2, %v269_v32  ;;  %v273_v43 = vmul.f32 %v859_v1, %v207_v28  ;;  %v228_v31 = vld [vmem:[%s852_s11 + $0x110] sm:$0xff]  ;;  %v229_v32 = vld [vmem:[%s852_s11 + $0x118] sm:$0xff] }
  0x49   : > { %396 = vst [vmem:[%s891_s25 + $0x30] sm:$0xff] %v332_v30  ;;  %v274_v44 = vmul.f32 %v859_v1, %v208_v33  ;;  %397 = vst [vmem:[%s891_s25 + $0x38] sm:$0xff] %v333_v35  ;;  %v336_v48 = vadd.f32 %v861_v2, %v270_v36  ;;  %v337_v49 = vadd.f32 %v861_v2, %v271_v37  ;;  %v230_v33 = vld [vmem:[%s852_s11 + $0x120] sm:$0xff] }
  0x4a   : > { %v338_v50 = vadd.f32 %v861_v2, %v272_v38  ;;  %v275_v51 = vmul.f32 %v859_v1, %v209_v34  ;;  %398 = vst [vmem:[%s891_s25 + $0x40] sm:$0xff] %v334_v41  ;;  %399 = vst [vmem:[%s891_s25 + $0x48] sm:$0xff] %v335_v42  ;;  %v339_v54 = vadd.f32 %v861_v2, %v273_v43  ;;  %v231_v38 = vld [vmem:[%s852_s11 + $0x128] sm:$0xff] }
  0x4b   : > { %v340_v55 = vadd.f32 %v861_v2, %v274_v44  ;;  %v276_v56 = vmul.f32 %v859_v1, %v210_v39  ;;  %v277_v57 = vmul.f32 %v859_v1, %v211_v40  ;;  %400 = vst [vmem:[%s891_s25 + $0x50] sm:$0xff] %v336_v48  ;;  %401 = vst [vmem:[%s891_s25 + $0x58] sm:$0xff] %v337_v49  ;;  %v232_v39 = vld [vmem:[%s852_s11 + $0x130] sm:$0xff]  ;;  %v233_v44 = vld [vmem:[%s852_s11 + $0x138] sm:$0xff] }
  0x4c   : > { %402 = vst [vmem:[%s891_s25 + $0x60] sm:$0xff] %v338_v50  ;;  %v341_v59 = vadd.f32 %v861_v2, %v275_v51  ;;  %v278_v60 = vmul.f32 %v859_v1, %v212_v45  ;;  %v279_v61 = vmul.f32 %v859_v1, %v213_v46  ;;  %v280_v62 = vmul.f32 %v859_v1, %v214_v47  ;;  %v234_v49 = vld [vmem:[%s852_s11 + $0x140] sm:$0xff]  ;;  %v235_v50 = vld [vmem:[%s852_s11 + $0x148] sm:$0xff] }
  0x4d   : > { %403 = vst [vmem:[%s891_s25 + $0x68] sm:$0xff] %v339_v54  ;;  %404 = vst [vmem:[%s891_s25 + $0x70] sm:$0xff] %v340_v55  ;;  %v342_v3 = vadd.f32 %v861_v2, %v276_v56  ;;  %v343_v4 = vadd.f32 %v861_v2, %v277_v57  ;;  %v281_v5 = vmul.f32 %v859_v1, %v215_v52  ;;  %v236_v55 = vld [vmem:[%s852_s11 + $0x150] sm:$0xff]  ;;  %v237_v56 = vld [vmem:[%s852_s11 + $0x158] sm:$0xff] }
  0x4e   : > { %v282_v6 = vmul.f32 %v859_v1, %v216_v53  ;;  %405 = vst [vmem:[%s891_s25 + $0x78] sm:$0xff] %v341_v59  ;;  %v344_v10 = vadd.f32 %v861_v2, %v278_v60  ;;  %v345_v11 = vadd.f32 %v861_v2, %v279_v61  ;;  %v346_v12 = vadd.f32 %v861_v2, %v280_v62  ;;  %v238_v57 = vld [vmem:[%s852_s11 + $0x160] sm:$0xff]  ;;  %v239_v62 = vld [vmem:[%s852_s11 + $0x168] sm:$0xff] }
  0x4f   : > { %v283_v13 = vmul.f32 %v859_v1, %v217_v58  ;;  %406 = vst [vmem:[%s891_s25 + $0x80] sm:$0xff] %v342_v3  ;;  %407 = vst [vmem:[%s891_s25 + $0x88] sm:$0xff] %v343_v4  ;;  %v347_v16 = vadd.f32 %v861_v2, %v281_v5  ;;  %v284_v18 = vmul.f32 %v859_v1, %v218_v63  ;;  %v240_v63 = vld [vmem:[%s852_s11 + $0x170] sm:$0xff] }
  0x50   : > { %v348_v17 = vadd.f32 %v861_v2, %v282_v6  ;;  %v285_v19 = vmul.f32 %v859_v1, %v219_v0  ;;  %408 = vst [vmem:[%s891_s25 + $0x90] sm:$0xff] %v344_v10  ;;  %409 = vst [vmem:[%s891_s25 + $0x98] sm:$0xff] %v345_v11  ;;  %v286_v22 = vmul.f32 %v859_v1, %v220_v7  ;;  %v241_v6 = vld [vmem:[%s852_s11 + $0x178] sm:$0xff]  ;;  %v242_v11 = vld [vmem:[%s852_s11 + $0x180] sm:$0xff] }
  0x51   : > { %410 = vst [vmem:[%s891_s25 + $0xa0] sm:$0xff] %v346_v12  ;;  %v349_v21 = vadd.f32 %v861_v2, %v283_v13  ;;  %v287_v23 = vmul.f32 %v859_v1, %v221_v8  ;;  %v288_v24 = vmul.f32 %v859_v1, %v222_v9  ;;  %411 = vst [vmem:[%s891_s25 + $0xa8] sm:$0xff] %v347_v16  ;;  %v243_v12 = vld [vmem:[%s852_s11 + $0x188] sm:$0xff] }
  0x52   : > { %412 = vst [vmem:[%s891_s25 + $0xb0] sm:$0xff] %v348_v17  ;;  %v350_v27 = vadd.f32 %v861_v2, %v284_v18  ;;  %v351_v28 = vadd.f32 %v861_v2, %v285_v19  ;;  %v289_v29 = vmul.f32 %v859_v1, %v223_v14  ;;  %v290_v30 = vmul.f32 %v859_v1, %v224_v15  ;;  %v244_v17 = vld [vmem:[%s852_s11 + $0x190] sm:$0xff]  ;;  %v245_v18 = vld [vmem:[%s852_s11 + $0x198] sm:$0xff]  ;;  %v246_v19 = vld [vmem:[%s852_s11 + $0x1a0] sm:$0xff] }
  0x53   : > { %413 = vst [vmem:[%s891_s25 + $0xb8] sm:$0xff] %v349_v21  ;;  %v352_v34 = vadd.f32 %v861_v2, %v286_v22  ;;  %v353_v35 = vadd.f32 %v861_v2, %v287_v23  ;;  %v354_v36 = vadd.f32 %v861_v2, %v288_v24  ;;  %v291_v37 = vmul.f32 %v859_v1, %v225_v20  ;;  %v247_v24 = vld [vmem:[%s852_s11 + $0x1a8] sm:$0xff] }
  0x54   : > { %414 = vst [vmem:[%s891_s25 + $0xc0] sm:$0xff] %v350_v27  ;;  %415 = vst [vmem:[%s891_s25 + $0xc8] sm:$0xff] %v351_v28  ;;  %v355_v40 = vadd.f32 %v861_v2, %v289_v29  ;;  %v356_v41 = vadd.f32 %v861_v2, %v290_v30  ;;  %v292_v42 = vmul.f32 %v859_v1, %v226_v25  ;;  %v248_v25 = vld [vmem:[%s852_s11 + $0x1b0] sm:$0xff]  ;;  %v249_v30 = vld [vmem:[%s852_s11 + $0x1b8] sm:$0xff] }
  0x55   : > { %v293_v43 = vmul.f32 %v859_v1, %v227_v26  ;;  %416 = vst [vmem:[%s891_s25 + $0xd0] sm:$0xff] %v352_v34  ;;  %417 = vst [vmem:[%s891_s25 + $0xd8] sm:$0xff] %v353_v35  ;;  %v357_v45 = vadd.f32 %v861_v2, %v291_v37  ;;  %v294_v46 = vmul.f32 %v859_v1, %v228_v31  ;;  %v250_v35 = vld [vmem:[%s852_s11 + $0x1c0] sm:$0xff] }
  0x56   : > { %418 = vst [vmem:[%s891_s25 + $0xe0] sm:$0xff] %v354_v36  ;;  %v295_v47 = vmul.f32 %v859_v1, %v229_v32  ;;  %v296_v48 = vmul.f32 %v859_v1, %v230_v33  ;;  %419 = vst [vmem:[%s891_s25 + $0xe8] sm:$0xff] %v355_v40  ;;  %v358_v51 = vadd.f32 %v861_v2, %v292_v42  ;;  %v251_v36 = vld [vmem:[%s852_s11 + $0x1c8] sm:$0xff]  ;;  %v253_v42 = vld [vmem:[%s852_s11 + $0x1d8] sm:$0xff] }
  0x57   : > { %420 = vst [vmem:[%s891_s25 + $0xf0] sm:$0xff] %v356_v41  ;;  %v359_v52 = vadd.f32 %v861_v2, %v293_v43  ;;  %v297_v53 = vmul.f32 %v859_v1, %v231_v38  ;;  %v298_v54 = vmul.f32 %v859_v1, %v232_v39  ;;  %421 = vst [vmem:[%s891_s25 + $0xf8] sm:$0xff] %v357_v45  ;;  %v252_v41 = vld [vmem:[%s852_s11 + $0x1d0] sm:$0xff]  ;;  %v254_v43 = vld [vmem:[%s852_s11 + $0x1e0] sm:$0xff] }
  0x58   : > { %v360_v58 = vadd.f32 %v861_v2, %v294_v46  ;;  %v361_v59 = vadd.f32 %v861_v2, %v295_v47  ;;  %v362_v60 = vadd.f32 %v861_v2, %v296_v48  ;;  %v299_v61 = vmul.f32 %v859_v1, %v233_v44  ;;  %422 = vst [vmem:[%s891_s25 + $0x100] sm:$0xff] %v358_v51  ;;  %v255_v48 = vld [vmem:[%s852_s11 + $0x1e8] sm:$0xff] }
  0x59   : > { %423 = vst [vmem:[%s891_s25 + $0x108] sm:$0xff] %v359_v52  ;;  %v363_v0 = vadd.f32 %v861_v2, %v297_v53  ;;  %v364_v3 = vadd.f32 %v861_v2, %v298_v54  ;;  %v300_v4 = vmul.f32 %v859_v1, %v234_v49  ;;  %v301_v5 = vmul.f32 %v859_v1, %v235_v50  ;;  %v256_v49 = vld [vmem:[%s852_s11 + $0x1f0] sm:$0xff]  ;;  %v257_v54 = vld [vmem:[%s852_s11 + $0x1f8] sm:$0xff] }
  0x5a   : > { %424 = vst [vmem:[%s891_s25 + $0x110] sm:$0xff] %v360_v58  ;;  %425 = vst [vmem:[%s891_s25 + $0x118] sm:$0xff] %v361_v59  ;;  %v365_v7 = vadd.f32 %v861_v2, %v299_v61  ;;  %v302_v8 = vmul.f32 %v859_v1, %v236_v55  ;;  %v303_v9 = vmul.f32 %v859_v1, %v237_v56 }
  0x5b   : > { %426 = vst [vmem:[%s891_s25 + $0x120] sm:$0xff] %v362_v60  ;;  %v304_v10 = vmul.f32 %v859_v1, %v238_v57  ;;  %427 = vst [vmem:[%s891_s25 + $0x128] sm:$0xff] %v363_v0  ;;  %v366_v13 = vadd.f32 %v861_v2, %v300_v4  ;;  %v367_v14 = vadd.f32 %v861_v2, %v301_v5 }
  0x5c   : > { %428 = vst [vmem:[%s891_s25 + $0x130] sm:$0xff] %v364_v3  ;;  %v305_v15 = vmul.f32 %v859_v1, %v239_v62  ;;  %v306_v16 = vmul.f32 %v859_v1, %v240_v63  ;;  %429 = vst [vmem:[%s891_s25 + $0x138] sm:$0xff] %v365_v7  ;;  %v368_v20 = vadd.f32 %v861_v2, %v302_v8 }
  0x5d   : > { %v369_v21 = vadd.f32 %v861_v2, %v303_v9  ;;  %v370_v22 = vadd.f32 %v861_v2, %v304_v10  ;;  %v307_v23 = vmul.f32 %v859_v1, %v241_v6  ;;  %430 = vst [vmem:[%s891_s25 + $0x140] sm:$0xff] %v366_v13  ;;  %431 = vst [vmem:[%s891_s25 + $0x148] sm:$0xff] %v367_v14 }
  0x5e   : > { %v371_v26 = vadd.f32 %v861_v2, %v305_v15  ;;  %v372_v27 = vadd.f32 %v861_v2, %v306_v16  ;;  %v308_v28 = vmul.f32 %v859_v1, %v242_v11  ;;  %v309_v29 = vmul.f32 %v859_v1, %v243_v12  ;;  %432 = vst [vmem:[%s891_s25 + $0x150] sm:$0xff] %v368_v20 }
  0x5f   : > { %433 = vst [vmem:[%s891_s25 + $0x158] sm:$0xff] %v369_v21  ;;  %434 = vst [vmem:[%s891_s25 + $0x160] sm:$0xff] %v370_v22  ;;  %v373_v31 = vadd.f32 %v861_v2, %v307_v23  ;;  %v310_v32 = vmul.f32 %v859_v1, %v244_v17  ;;  %v311_v33 = vmul.f32 %v859_v1, %v245_v18 }
  0x60   : > { %v312_v34 = vmul.f32 %v859_v1, %v246_v19  ;;  %435 = vst [vmem:[%s891_s25 + $0x168] sm:$0xff] %v371_v26  ;;  %436 = vst [vmem:[%s891_s25 + $0x170] sm:$0xff] %v372_v27  ;;  %v374_v37 = vadd.f32 %v861_v2, %v308_v28  ;;  %v375_v38 = vadd.f32 %v861_v2, %v309_v29 }
  0x61   : > { %v313_v39 = vmul.f32 %v859_v1, %v247_v24  ;;  %v314_v40 = vmul.f32 %v859_v1, %v248_v25  ;;  %437 = vst [vmem:[%s891_s25 + $0x178] sm:$0xff] %v373_v31  ;;  %v376_v44 = vadd.f32 %v861_v2, %v310_v32  ;;  %v377_v45 = vadd.f32 %v861_v2, %v311_v33 }
  0x62   : > { %v378_v46 = vadd.f32 %v861_v2, %v312_v34  ;;  %v315_v47 = vmul.f32 %v859_v1, %v249_v30  ;;  %438 = vst [vmem:[%s891_s25 + $0x180] sm:$0xff] %v374_v37  ;;  %439 = vst [vmem:[%s891_s25 + $0x188] sm:$0xff] %v375_v38  ;;  %v316_v52 = vmul.f32 %v859_v1, %v250_v35 }
  0x63   : > { %v379_v50 = vadd.f32 %v861_v2, %v313_v39  ;;  %v380_v51 = vadd.f32 %v861_v2, %v314_v40  ;;  %v317_v53 = vmul.f32 %v859_v1, %v251_v36  ;;  %440 = vst [vmem:[%s891_s25 + $0x190] sm:$0xff] %v376_v44  ;;  %441 = vst [vmem:[%s891_s25 + $0x198] sm:$0xff] %v377_v45 }
  0x64   : > { %442 = vst [vmem:[%s891_s25 + $0x1a0] sm:$0xff] %v378_v46  ;;  %v381_v55 = vadd.f32 %v861_v2, %v315_v47  ;;  %v318_v56 = vmul.f32 %v859_v1, %v252_v41  ;;  %v319_v57 = vmul.f32 %v859_v1, %v253_v42  ;;  %v320_v58 = vmul.f32 %v859_v1, %v254_v43 }
  0x65   : > { %443 = vst [vmem:[%s891_s25 + $0x1a8] sm:$0xff] %v379_v50  ;;  %444 = vst [vmem:[%s891_s25 + $0x1b0] sm:$0xff] %v380_v51  ;;  %v382_v59 = vadd.f32 %v861_v2, %v316_v52  ;;  %v383_v60 = vadd.f32 %v861_v2, %v317_v53  ;;  %v321_v61 = vmul.f32 %v859_v1, %v255_v48 }
  0x66   : > { %v322_v62 = vmul.f32 %v859_v1, %v256_v49  ;;  %445 = vst [vmem:[%s891_s25 + $0x1b8] sm:$0xff] %v381_v55  ;;  %v384_v63 = vadd.f32 %v861_v2, %v318_v56  ;;  %v385_v0 = vadd.f32 %v861_v2, %v319_v57  ;;  %v386_v3 = vadd.f32 %v861_v2, %v320_v58 }
  0x67   : > { %v323_v4 = vmul.f32 %v859_v1, %v257_v54  ;;  %446 = vst [vmem:[%s891_s25 + $0x1c0] sm:$0xff] %v382_v59  ;;  %447 = vst [vmem:[%s891_s25 + $0x1c8] sm:$0xff] %v383_v60  ;;  %v387_v5 = vadd.f32 %v861_v2, %v321_v61 }
  0x68   : > { %v388_v6 = vadd.f32 %v861_v2, %v322_v62  ;;  %448 = vst [vmem:[%s891_s25 + $0x1d0] sm:$0xff] %v384_v63  ;;  %449 = vst [vmem:[%s891_s25 + $0x1d8] sm:$0xff] %v385_v0 }
  0x69   : > { %450 = vst [vmem:[%s891_s25 + $0x1e0] sm:$0xff] %v386_v3  ;;  %v389_v1 = vadd.f32 %v861_v2, %v323_v4  ;;  %451 = vst [vmem:[%s891_s25 + $0x1e8] sm:$0xff] %v387_v5 }
  0x6a   : > { %452 = vst [vmem:[%s891_s25 + $0x1f0] sm:$0xff] %v388_v6 }
  0x6b   : > { %453 = vst [vmem:[%s891_s25 + $0x1f8] sm:$0xff] %v389_v1 }
  0x6c   : > { %655 = shalt.err (!%p652_p2)
}
  0x6d   : > { %s656_s24 = scalar_lea.hbm %s1120_s13, 8192  ;;  %s660_s30 = scalar_lea.hbm %s1176_s3, 16384 }
  0x6e   : > { %p657_p4 = scmp.ne.s32.totalorder %s1120_s13, %s656_s24  ;;  %p661_p9 = scmp.lt.u32.totalorder %s1120_s13, %s1176_s3 }
  0x6f   : > { %p662_p1 = scmp.lt.u32.totalorder %s660_s30, %s656_s24  ;;  %p664_p6 = scmp.lt.u32.totalorder %s656_s24, %s1120_s13 }
  0x70   : > { %p658_p5 = pnand %p657_p4, %p1183_p11 }
  0x71   : > { %p663_p3 = por %p662_p1, %p661_p9 }
  0x72   : > { %p659_p7 = pneg %p658_p5 }
  0x73   : > { %p665_p12 = por %p664_p6, %p663_p3 }
  0x75   : > { %p666_p13 = pnand %p665_p12, %p659_p7 }
  0x77   : > { %669 = shalt.err (!%p666_p13)
}
  0x78   : > { %s714_s11 = smov 2048   ;;  %s715_s6 = smov 128  }
  0x79   : > { %564 = dma.vmem_to_hbm [thread:$0]  (%p1183_p11), %s1122_s10, 8192, %s1120_s13, %s455_s14, %s714_s11, %s714_s11, %s715_s6  }
  0x7a PF: > { %s484_s8 = sand.u32 1, %s696_s16   ;;  %p1184_p8 = scmp.ne.s32.totalorder %s1181_s27, 0 }
  0x7b   : > { %p1185_p10 = scmp.ge.s32.totalorder %s708_s19, 2  ;;  %s485_s25 = scalar_lea.sflag [#allocation6], %s484_s8 }
  0x7d   : > { %p571_p0 = pnand %p1185_p10, %p1184_p8 }
  0x7f   : > { %691 = dma.done.wait (!%p571_p0), %s485_s25, 8192  }
  0x80   : > { %693 = vsyncadd (!%p571_p0), %s485_s25, 4294959104  ;;  %p18_p2 = scmp.ge.s32.totalorder %s767_s20, 4   ;;  %s1186_s16 = smov %s700_s17 }
  0x81   : > { %s1187_s17 = smov %s704_s18  ;;  %s1188_s18 = smov %s779_s23 }
  0x82   : > { %s1189_s19 = smov %s767_s20  ;;  %20 = sbr.rel (!%p18_p2) target bundleno = 8 (0x8), region = 77 }
  0x89   :  { %490 = vsyncpa [#allocation5], 1 }
  0x8a   :  { %492 = vsyncpa [#allocation5 + $0x1], 1 }
  0x8b   :  { %493 = vsyncpa [#allocation6], 1 }
  0x8c   :  { %495 = vsyncpa [#allocation6 + $0x1], 1 }

</bundles_post_ra>
